<compile_context>
chip_gen: v5e
topology: v5e:2x2
jax: 0.10.0
libtpu: 0.0.40
codegen_flags: <defaults>
</compile_context>

<pallas_src>
import jax
import jax.numpy as jnp
from jax.experimental import pallas as pl
from jax.experimental.pallas import tpu as pltpu


def _leaky_relu(x, slope=0.2):
    return jnp.where(x > 0, x, slope * x)


def _round_up(n, m):
    return (n + m - 1) // m * m


def wdiscriminator_kernel(xt_ref, w1_ref, b1_ref, w2_ref, b2_ref, w3_ref,
                          b3_ref, o_ref):
    """One tile of `tile_m` batch rows, feature-major, fully in VMEM.

    xt_ref : (H,  tile_m) bf16   input rows, transposed (batch on lanes)
    w1_ref : (H2, H)      bf16   Linear1 weight, PyTorch (out, in) layout
    b1_ref : (H2, 1)      f32
    w2_ref : (H2, H2)     bf16   Linear2 weight, PyTorch (out, in) layout
    b2_ref : (H2, 1)      f32
    w3_ref : (H2, 1)      f32    Linear3 weight as a column
    b3_ref : (1, 1)       f32
    o_ref  : (1, tile_m)  f32    lane-dense output row
    """
    # Layer 1: (H2, H) @ (H, tile_m) -> (H2, tile_m), f32 accumulate on MXU.
    h = jnp.dot(w1_ref[...], xt_ref[...], preferred_element_type=jnp.float32)
    h = _leaky_relu(h + b1_ref[...])
    h = h.astype(jnp.bfloat16)

    # Layer 2: (H2, H2) @ (H2, tile_m) -> (H2, tile_m).
    h = jnp.dot(w2_ref[...], h, preferred_element_type=jnp.float32)
    h = _leaky_relu(h + b2_ref[...])

    # Layer 3 (output width 1): broadcast-multiply + sublane reduction on the
    # VPU/XLU instead of a 1-column MXU matmul; result is lane-major directly.
    o = jnp.sum(h * w3_ref[...], axis=0, keepdims=True) + b3_ref[...]
    o_ref[...] = o.astype(o_ref.dtype)


def wdiscriminator_forward(x, params, *, tile_m=None):
    """x: (N, hidden_size) float. Returns (N, 1) float32."""
    w1, b1, w2, b2, w3, b3 = params
    N, H = x.shape
    H2 = w1.shape[0]

    if tile_m is None:
        # Single grid step for small batches; 512-row tiles otherwise
        # (multiple of 128 and 256 -> fills the MXU on v5e/v6e/v7x while
        # keeping per-step VMEM use to a few MiB, well under the v7x scoped
        # limit). Callers can override for per-generation tuning.
        tile_m = min(_round_up(max(N, 1), 128), 512)

    n_pad = _round_up(N, tile_m)

    # Feature-major, bf16 input; pad the batch (lane) axis to a tile multiple.
    xt = jnp.transpose(x).astype(jnp.bfloat16)
    if n_pad != N:
        xt = jnp.pad(xt, ((0, 0), (0, n_pad - N)))

    grid = (n_pad // tile_m,)

    in_specs = [
        pl.BlockSpec((H, tile_m), lambda i: (0, i)),   # x^T tile
        pl.BlockSpec((H2, H), lambda i: (0, 0)),       # W1 (resident)
        pl.BlockSpec((H2, 1), lambda i: (0, 0)),       # b1
        pl.BlockSpec((H2, H2), lambda i: (0, 0)),      # W2 (resident)
        pl.BlockSpec((H2, 1), lambda i: (0, 0)),       # b2
        pl.BlockSpec((H2, 1), lambda i: (0, 0)),       # W3 column
        pl.BlockSpec((1, 1), lambda i: (0, 0)),        # b3
    ]
    out_spec = pl.BlockSpec((1, tile_m), lambda i: (0, i))  # lane-dense output

    out = pl.pallas_call(
        wdiscriminator_kernel,
        out_shape=jax.ShapeDtypeStruct((1, n_pad), jnp.float32),
        grid_spec=pltpu.PrefetchScalarGridSpec(
            num_scalar_prefetch=0,
            grid=grid,
            in_specs=in_specs,
            out_specs=out_spec,
        ),
        compiler_params=pltpu.CompilerParams(
            dimension_semantics=("parallel",)),
    )(xt, w1, b1, w2, b2, w3, b3)

    # (1, n_pad) lane-dense -> (N, 1); drop padded rows.
    return out.reshape(n_pad, 1)[:N]


def init_params(key, hidden_size, hidden_size2):
    """Deterministic synthetic init matching nn.Linear, in kernel layout.

    PyTorch stores Linear weight as (out, in); the kernel multiplies W @ x^T,
    so W1/W2 are consumed in that layout directly (no transpose needed).
    """
    ks = jax.random.split(key, 6)

    def linear(kw, kb, fan_in, fan_out):
        bound = 1.0 / jnp.sqrt(fan_in)
        w_pt = jax.random.uniform(kw, (fan_out, fan_in), jnp.float32, -bound, bound)
        b = jax.random.uniform(kb, (fan_out,), jnp.float32, -bound, bound)
        return w_pt, b

    w1, b1 = linear(ks[0], ks[1], hidden_size, hidden_size2)
    w2, b2 = linear(ks[2], ks[3], hidden_size2, hidden_size2)
    w3, b3 = linear(ks[4], ks[5], hidden_size2, 1)

    return (
        w1.astype(jnp.bfloat16),          # (H2, H)  bf16
        b1.reshape(hidden_size2, 1),      # (H2, 1)  f32
        w2.astype(jnp.bfloat16),          # (H2, H2) bf16
        b2.reshape(hidden_size2, 1),      # (H2, 1)  f32
        w3.T.astype(jnp.float32),         # (H2, 1)  f32
        b3.reshape(1, 1),                 # (1, 1)   f32
    )


def reference_forward(x, params):
    """Pure-JAX reference mirroring the PyTorch forward (same bf16 weights)."""
    w1, b1, w2, b2, w3, b3 = params
    xb = x.astype(jnp.bfloat16)
    h = jnp.dot(xb, w1.T, preferred_element_type=jnp.float32) + b1.reshape(1, -1)
    h = jnp.where(h > 0, h, 0.2 * h).astype(jnp.bfloat16)
    h = jnp.dot(h, w2.T, preferred_element_type=jnp.float32) + b2.reshape(1, -1)
    h = jnp.where(h > 0, h, 0.2 * h)
    return jnp.dot(h, w3) + b3.reshape(1, 1)


if __name__ == "__main__":
    hidden_size = 32      # input dim
    hidden_size2 = 128    # hidden dim (module default is 512; small for test)
    batch = 16

    key = jax.random.PRNGKey(0)
    k_x, k_p = jax.random.split(key)
    x = jax.random.normal(k_x, (batch, hidden_size), jnp.float32)
    params = init_params(k_p, hidden_size, hidden_size2)

    # Small-batch fast path: single grid step (batch padded to one 128-row tile).
    out = jax.block_until_ready(wdiscriminator_forward(x, params))
    ref = reference_forward(x, params)
    assert out.shape == (batch, 1)
    assert jnp.allclose(out, ref, atol=2e-3, rtol=2e-2), "mismatch (small batch)"

    # Non-multiple batch with an explicit smaller tile: exercises padding and
    # a multi-step ("parallel") grid.
    x2 = jax.random.normal(jax.random.PRNGKey(1), (300, hidden_size), jnp.float32)
    out2 = jax.block_until_ready(wdiscriminator_forward(x2, params, tile_m=128))
    ref2 = reference_forward(x2, params)
    assert out2.shape == (300, 1)
    assert jnp.allclose(out2, ref2, atol=2e-3, rtol=2e-2), "mismatch (multi-tile)"

    print("KERNEL_OK")
</pallas_src>

<mosaic_0001>
module attributes {stable_mosaic.version = 11 : i64} {
  func.func @wdiscriminator_kernel(%arg0: i32, %arg1: memref<32x128xbf16, #tpu.memory_space<vmem>>, %arg2: memref<128x32xbf16, #tpu.memory_space<vmem>>, %arg3: memref<128x1xf32, #tpu.memory_space<vmem>>, %arg4: memref<128x128xbf16, #tpu.memory_space<vmem>>, %arg5: memref<128x1xf32, #tpu.memory_space<vmem>>, %arg6: memref<128x1xf32, #tpu.memory_space<vmem>>, %arg7: memref<1x1xf32, #tpu.memory_space<vmem>>, %arg8: memref<1x128xf32, #tpu.memory_space<vmem>>) attributes {dimension_semantics = [#tpu.dimension_semantics<parallel>], iteration_bounds = array<i64: 1>, scalar_prefetch = 0 : i64, scratch_operands = 0 : i64, tpu.core_type = #tpu.core_type<tc>, window_params = [{transform_indices = @transform_0, window_bounds = array<i64: 32, 128>}, {pipeline_mode = #tpu.pipeline_mode<synchronous>, transform_indices = @transform_1, window_bounds = array<i64: 128, 32>}, {pipeline_mode = #tpu.pipeline_mode<synchronous>, transform_indices = @transform_2, window_bounds = array<i64: 128, 1>}, {pipeline_mode = #tpu.pipeline_mode<synchronous>, transform_indices = @transform_3, window_bounds = array<i64: 128, 128>}, {pipeline_mode = #tpu.pipeline_mode<synchronous>, transform_indices = @transform_4, window_bounds = array<i64: 128, 1>}, {pipeline_mode = #tpu.pipeline_mode<synchronous>, transform_indices = @transform_5, window_bounds = array<i64: 128, 1>}, {pipeline_mode = #tpu.pipeline_mode<synchronous>, transform_indices = @transform_6, window_bounds = array<i64: 1, 1>}, {transform_indices = @transform_7, window_bounds = array<i64: 1, 128>}]} {
    %c0 = arith.constant 0 : index
    %c0_0 = arith.constant 0 : index
    %0 = vector.load %arg2[%c0, %c0_0] : memref<128x32xbf16, #tpu.memory_space<vmem>>, vector<128x32xbf16>
    %c0_1 = arith.constant 0 : index
    %c0_2 = arith.constant 0 : index
    %1 = vector.load %arg1[%c0_1, %c0_2] : memref<32x128xbf16, #tpu.memory_space<vmem>>, vector<32x128xbf16>
    %cst = arith.constant dense<0.000000e+00> : vector<128x128xf32>
    %2 = tpu.matmul %0, %1, %cst {dimension_numbers = #tpu.dot_dimension_numbers<[1], [0], [0], [1], [0, 0, 1, 1], [], []>} : vector<128x32xbf16>, vector<32x128xbf16>, vector<128x128xf32> -> vector<128x128xf32>
    %c0_3 = arith.constant 0 : index
    %c0_4 = arith.constant 0 : index
    %3 = vector.load %arg3[%c0_3, %c0_4] : memref<128x1xf32, #tpu.memory_space<vmem>>, vector<128x1xf32>
    %4 = vector.broadcast %3 : vector<128x1xf32> to vector<128x128xf32>
    %5 = arith.addf %2, %4 : vector<128x128xf32>
    %cst_5 = arith.constant 0.000000e+00 : f32
    %6 = vector.broadcast %cst_5 : f32 to vector<128x128xf32>
    %7 = arith.cmpf ogt, %5, %6 : vector<128x128xf32>
    %cst_6 = arith.constant 2.000000e-01 : f32
    %8 = vector.broadcast %cst_6 : f32 to vector<128x128xf32>
    %9 = arith.mulf %8, %5 : vector<128x128xf32>
    %10 = arith.select %7, %5, %9 : vector<128x128xi1>, vector<128x128xf32>
    %11 = arith.truncf %10 : vector<128x128xf32> to vector<128x128xbf16>
    %c0_7 = arith.constant 0 : index
    %c0_8 = arith.constant 0 : index
    %12 = vector.load %arg4[%c0_7, %c0_8] : memref<128x128xbf16, #tpu.memory_space<vmem>>, vector<128x128xbf16>
    %cst_9 = arith.constant dense<0.000000e+00> : vector<128x128xf32>
    %13 = tpu.matmul %12, %11, %cst_9 {dimension_numbers = #tpu.dot_dimension_numbers<[1], [0], [0], [1], [0, 0, 1, 1], [], []>} : vector<128x128xbf16>, vector<128x128xbf16>, vector<128x128xf32> -> vector<128x128xf32>
    %c0_10 = arith.constant 0 : index
    %c0_11 = arith.constant 0 : index
    %14 = vector.load %arg5[%c0_10, %c0_11] : memref<128x1xf32, #tpu.memory_space<vmem>>, vector<128x1xf32>
    %15 = vector.broadcast %14 : vector<128x1xf32> to vector<128x128xf32>
    %16 = arith.addf %13, %15 : vector<128x128xf32>
    %cst_12 = arith.constant 0.000000e+00 : f32
    %17 = vector.broadcast %cst_12 : f32 to vector<128x128xf32>
    %18 = arith.cmpf ogt, %16, %17 : vector<128x128xf32>
    %cst_13 = arith.constant 2.000000e-01 : f32
    %19 = vector.broadcast %cst_13 : f32 to vector<128x128xf32>
    %20 = arith.mulf %19, %16 : vector<128x128xf32>
    %21 = arith.select %18, %16, %20 : vector<128x128xi1>, vector<128x128xf32>
    %c0_14 = arith.constant 0 : index
    %c0_15 = arith.constant 0 : index
    %22 = vector.load %arg6[%c0_14, %c0_15] : memref<128x1xf32, #tpu.memory_space<vmem>>, vector<128x1xf32>
    %23 = vector.broadcast %22 : vector<128x1xf32> to vector<128x128xf32>
    %24 = arith.mulf %21, %23 : vector<128x128xf32>
    %cst_16 = arith.constant dense<0.000000e+00> : vector<128xf32>
    %25 = vector.multi_reduction <add>, %24, %cst_16 [0] : vector<128x128xf32> to vector<128xf32>
    %26 = vector.shape_cast %25 : vector<128xf32> to vector<1x128xf32>
    %c0_17 = arith.constant 0 : index
    %c0_18 = arith.constant 0 : index
    %27 = vector.load %arg7[%c0_17, %c0_18] : memref<1x1xf32, #tpu.memory_space<vmem>>, vector<1x1xf32>
    %28 = vector.broadcast %27 : vector<1x1xf32> to vector<1x128xf32>
    %29 = arith.addf %26, %28 : vector<1x128xf32>
    %c0_19 = arith.constant 0 : index
    %c0_20 = arith.constant 0 : index
    %30 = vector.load %arg8[%c0_19, %c0_20] : memref<1x128xf32, #tpu.memory_space<vmem>>, vector<1x128xf32>
    tpu.vector_store %arg8[%c0_19, %c0_20], %29 {strides = array<i32>} : memref<1x128xf32, #tpu.memory_space<vmem>>, vector<1x128xf32>,
    return
  }
  func.func @transform_0(%arg0: i32) -> (i32, i32) {
    %c0_i32 = arith.constant 0 : i32
    %c0_i32_0 = arith.constant 0 : i32
    return %c0_i32, %arg0 : i32, i32
  }
  func.func @transform_1(%arg0: i32) -> (i32, i32) {
    %c0_i32 = arith.constant 0 : i32
    %c0_i32_0 = arith.constant 0 : i32
    %c0_i32_1 = arith.constant 0 : i32
    return %c0_i32, %c0_i32_0 : i32, i32
  }
  func.func @transform_2(%arg0: i32) -> (i32, i32) {
    %c0_i32 = arith.constant 0 : i32
    %c0_i32_0 = arith.constant 0 : i32
    %c0_i32_1 = arith.constant 0 : i32
    return %c0_i32, %c0_i32_0 : i32, i32
  }
  func.func @transform_3(%arg0: i32) -> (i32, i32) {
    %c0_i32 = arith.constant 0 : i32
    %c0_i32_0 = arith.constant 0 : i32
    %c0_i32_1 = arith.constant 0 : i32
    return %c0_i32, %c0_i32_0 : i32, i32
  }
  func.func @transform_4(%arg0: i32) -> (i32, i32) {
    %c0_i32 = arith.constant 0 : i32
    %c0_i32_0 = arith.constant 0 : i32
    %c0_i32_1 = arith.constant 0 : i32
    return %c0_i32, %c0_i32_0 : i32, i32
  }
  func.func @transform_5(%arg0: i32) -> (i32, i32) {
    %c0_i32 = arith.constant 0 : i32
    %c0_i32_0 = arith.constant 0 : i32
    %c0_i32_1 = arith.constant 0 : i32
    return %c0_i32, %c0_i32_0 : i32, i32
  }
  func.func @transform_6(%arg0: i32) -> (i32, i32) {
    %c0_i32 = arith.constant 0 : i32
    %c0_i32_0 = arith.constant 0 : i32
    %c0_i32_1 = arith.constant 0 : i32
    return %c0_i32, %c0_i32_0 : i32, i32
  }
  func.func @transform_7(%arg0: i32) -> (i32, i32) {
    %c0_i32 = arith.constant 0 : i32
    %c0_i32_0 = arith.constant 0 : i32
    return %c0_i32, %arg0 : i32, i32
  }
}

</mosaic_0001>

<bundles_post_ra>
// kernel: tpu_custom_call.1
= control target key start
LH: loop header
LB: loop body
LE: loop exit
PB: predicated region body
PF: predicated region fallthrough
CT: control target
= control target key end

     0   :  { %s1191_s0 = inlined_call_operand.vmem [shape: bf16[32,128], index: 0, kind: input, shape index: {}]   ;;  %s1192_s1 = inlined_call_operand.vmem [shape: bf16[128,32], index: 1, kind: input, shape index: {}]   ;;  %s1193_s2 = inlined_call_operand.vmem [shape: f32[128,1], index: 2, kind: input, shape index: {}]   ;;  %s1194_s3 = inlined_call_operand.vmem [shape: bf16[128,128], index: 3, kind: input, shape index: {}]   ;;  %s1195_s4 = inlined_call_operand.vmem [shape: f32[128,1], index: 4, kind: input, shape index: {}]   ;;  %s1196_s5 = inlined_call_operand.vmem [shape: f32[128,1], index: 5, kind: input, shape index: {}]   ;;  %s1197_s6 = inlined_call_operand.<no memory space> [shape: f32[1,1], index: 6, kind: input, shape index: {}]   ;;  %s1198_s7 = inlined_call_operand.hbm [shape: f32[1,128], index: 7, kind: output, shape index: {}]  }
   0x1   :  { %v12_v0 = vstv %s1197_s6 }
   0x2   :  { %13 = vst [vmem:[#allocation2] sm:$0x1] %v12_v0 }
   0x3   :  { %v64_v1 = vld [vmem:[%s1193_s2 + $0x70] sm:$0xff]  ;;  %v62_v2 = vld [vmem:[%s1193_s2 + $0x60] sm:$0xff]  ;;  %v882_v4 = vmov 0   ;;  %v832_v5 = vld [vmem:[%s1191_s0 + $0x8] sm:$0xff] }
   0x4   :  { %v60_v3 = vld [vmem:[%s1193_s2 + $0x50] sm:$0xff]  ;;  %855 = vset.pattern.permute.xlu2 %v882_v4  ;;  %854 = vset.pattern.permute.xlu1 %v882_v4  ;;  %v831_v6 = vld [vmem:[%s1191_s0] sm:$0xff]  ;;  %v65_v7 = vld [vmem:[%s1193_s2 + $0x78] sm:$0xff] }
   0x5   :  { %853 = vset.pattern.permute.xlu0 %v882_v4  ;;  %128 = vperm.xlu1 %854, %v62_v2   ;;  %v63_v8 = vld [vmem:[%s1193_s2 + $0x68] sm:$0xff] }
   0x6   :  { %138 = vperm.xlu0 %853, %v64_v1   ;;  %118 = vperm.xlu2 %855, %v60_v3  }
   0x7   :  { %229 = vmatpush.bf16.msra.mxu0 %v832_v5  ;;  %841 = vmatpush.bf16.msra.mxu3 %v832_v5 }
   0x8   :  { %14 = vsyncpa [#allocation4], 0  ;;  %v61_v9 = vld [vmem:[%s1193_s2 + $0x58] sm:$0xff]  ;;  %v823_v10 = vld [vmem:[%s1192_s1] sm:$0xff]  ;;  %vm198_vm0 = vcmask 261120  }
   0x9   :  { %v828_v11 = vld [vmem:[%s1192_s1 + $0x28] sm:$0xff]  ;;  %v58_v13 = vld [vmem:[%s1193_s2 + $0x40] sm:$0xff]  ;;  %v56_v14 = vld [vmem:[%s1193_s2 + $0x30] sm:$0xff] }
   0xa   :  { %v59_v12 = vld [vmem:[%s1193_s2 + $0x48] sm:$0xff]  ;;  %v57_v15 = vld [vmem:[%s1193_s2 + $0x38] sm:$0xff]  ;;  %v54_v16 = vld [vmem:[%s1193_s2 + $0x20] sm:$0xff] }
   0xb   :  { %230 = vmatpush.bf16.msra.mxu0 %v831_v6  ;;  %842 = vmatpush.bf16.msra.mxu3 %v831_v6  ;;  %v55_v17 = vld [vmem:[%s1193_s2 + $0x28] sm:$0xff]  ;;  %v829_v19 = vld [vmem:[%s1192_s1 + $0x30] sm:$0xff]  ;;  %v53_v20 = vld [vmem:[%s1193_s2 + $0x18] sm:$0xff] }
   0xc   :  { %v824_v18 = vld [vmem:[%s1192_s1 + $0x8] sm:$0xff]  ;;  %v52_v21 = vld [vmem:[%s1193_s2 + $0x10] sm:$0xff]  ;;  %v50_v22 = vld [vmem:[%s1193_s2] sm:$0xff] }
   0xd   :  { %133 = vperm.xlu1 %854, %v63_v8   ;;  %v344_v23 = vld [vmem:[%s1195_s4] sm:$0xff]  ;;  %v51_v24 = vld [vmem:[%s1193_s2 + $0x8] sm:$0xff]  ;;  %v825_v26 = vld [vmem:[%s1192_s1 + $0x10] sm:$0xff]  ;;  %s734_s2 = sshll.u32 %s1198_s7, 4  ;;  %s735_s2 = int_to_ptr.hbm [resolvable:$true] %s734_s2 }
   0xe   :  { %143 = vperm.xlu0 %853, %v65_v7   ;;  %123 = vperm.xlu2 %855, %v61_v9   ;;  %v345_v25 = vld [vmem:[%s1195_s4 + $0x8] sm:$0xff]  ;;  %v830_v27 = vld [vmem:[%s1192_s1 + $0x38] sm:$0xff]  ;;  %v346_v29 = vld [vmem:[%s1195_s4 + $0x10] sm:$0xff] }
   0xf   :  { %783 = vmatmul.msk.bf16.vlgmr.msra.gmra.mxu0 %vm198_vm0, %v823_v10  ;;  %788 = vmatmul.msk.bf16.vlgmr.msra.gmra.mxu3 %vm198_vm0, %v828_v11  ;;  %v347_v28 = vld [vmem:[%s1195_s4 + $0x18] sm:$0xff]  ;;  %v348_v30 = vld [vmem:[%s1195_s4 + $0x20] sm:$0xff]  ;;  %v350_v31 = vld [vmem:[%s1195_s4 + $0x30] sm:$0xff] }
  0x10   :  { %v349_v32 = vld [vmem:[%s1195_s4 + $0x28] sm:$0xff]  ;;  %v351_v33 = vld [vmem:[%s1195_s4 + $0x38] sm:$0xff]  ;;  %v352_v36 = vld [vmem:[%s1195_s4 + $0x40] sm:$0xff] }
  0x11   :  { %v826_v34 = vld [vmem:[%s1192_s1 + $0x18] sm:$0xff]  ;;  %v353_v35 = vld [vmem:[%s1195_s4 + $0x48] sm:$0xff]  ;;  %v354_v37 = vld [vmem:[%s1195_s4 + $0x50] sm:$0xff] }
  0x12   :  { %v356_v38 = vld [vmem:[%s1195_s4 + $0x60] sm:$0xff]  ;;  %v355_v39 = vld [vmem:[%s1195_s4 + $0x58] sm:$0xff]  ;;  %v357_v40 = vld [vmem:[%s1195_s4 + $0x68] sm:$0xff] }
  0x13   :  { %v827_v41 = vld [vmem:[%s1192_s1 + $0x20] sm:$0xff]  ;;  %v359_v42 = vld [vmem:[%s1195_s4 + $0x78] sm:$0xff]  ;;  %v358_v43 = vld [vmem:[%s1195_s4 + $0x70] sm:$0xff] }
  0x14   :  { %v585_v44 = vld [vmem:[%s1196_s5] sm:$0xff]  ;;  %v587_v45 = vld [vmem:[%s1196_s5 + $0x10] sm:$0xff]  ;;  %v586_v46 = vld [vmem:[%s1196_s5 + $0x8] sm:$0xff] }
  0x15   :  { %113 = vperm.xlu1 %854, %v59_v12   ;;  %v588_v47 = vld [vmem:[%s1196_s5 + $0x18] sm:$0xff]  ;;  %v590_v48 = vld [vmem:[%s1196_s5 + $0x28] sm:$0xff]  ;;  %v589_v49 = vld [vmem:[%s1196_s5 + $0x20] sm:$0xff] }
  0x16   :  { %108 = vperm.xlu0 %853, %v58_v13   ;;  %98 = vperm.xlu2 %855, %v56_v14   ;;  %v591_v50 = vld [vmem:[%s1196_s5 + $0x30] sm:$0xff]  ;;  %v593_v51 = vld [vmem:[%s1196_s5 + $0x40] sm:$0xff]  ;;  %v592_v52 = vld [vmem:[%s1196_s5 + $0x38] sm:$0xff] }
  0x17   :  { %v594_v53 = vld [vmem:[%s1196_s5 + $0x48] sm:$0xff]  ;;  %v596_v54 = vld [vmem:[%s1196_s5 + $0x58] sm:$0xff]  ;;  %v595_v55 = vld [vmem:[%s1196_s5 + $0x50] sm:$0xff] }
  0x18   :  { %v597_v56 = vld [vmem:[%s1196_s5 + $0x60] sm:$0xff]  ;;  %v599_v59 = vld [vmem:[%s1196_s5 + $0x70] sm:$0xff]  ;;  %v598_v60 = vld [vmem:[%s1196_s5 + $0x68] sm:$0xff] }
  0x19   :  { %v600_v61 = vld [vmem:[%s1196_s5 + $0x78] sm:$0xff]  ;;  %v718_v0 = vld [vmem:[#allocation2] sm:$0x1] }
  0x1d   :  { %88 = vperm.xlu1 %854, %v54_v16  }
  0x1e   :  { %103 = vperm.xlu0 %853, %v57_v15   ;;  %93 = vperm.xlu2 %855, %v55_v17  }
  0x1f   :  { %784 = vmatmul.msk.bf16.gmra.mxu0 %vm198_vm0, %v824_v18  ;;  %789 = vmatmul.msk.bf16.gmra.mxu3 %vm198_vm0, %v829_v19 }
  0x25   :  { %83 = vperm.xlu1 %854, %v53_v20  }
  0x26   :  { %78 = vperm.xlu0 %853, %v52_v21   ;;  %68 = vperm.xlu2 %855, %v50_v22  }
  0x2d   :  { %362 = vperm.xlu1 %854, %v344_v23  }
  0x2e   :  { %73 = vperm.xlu0 %853, %v51_v24   ;;  %367 = vperm.xlu2 %855, %v345_v25  }
  0x2f   :  { %785 = vmatmul.msk.bf16.gmra.mxu0 %vm198_vm0, %v825_v26  ;;  %790 = vmatmul.msk.bf16.gmra.mxu3 %vm198_vm0, %v830_v27 }
  0x35   :  { %377 = vperm.xlu1 %854, %v347_v28  }
  0x36   :  { %372 = vperm.xlu0 %853, %v346_v29   ;;  %382 = vperm.xlu2 %855, %v348_v30  }
  0x3d   :  { %392 = vperm.xlu1 %854, %v350_v31  }
  0x3e   :  { %387 = vperm.xlu0 %853, %v349_v32   ;;  %397 = vperm.xlu2 %855, %v351_v33  }
  0x3f   :  { %786 = vmatmul.msk.bf16.gmra.mxu0 %vm198_vm0, %v826_v34 }
  0x45   :  { %407 = vperm.xlu1 %854, %v353_v35  }
  0x46   :  { %402 = vperm.xlu0 %853, %v352_v36   ;;  %412 = vperm.xlu2 %855, %v354_v37  }
  0x4d   :  { %422 = vperm.xlu1 %854, %v356_v38  }
  0x4e   :  { %417 = vperm.xlu0 %853, %v355_v39   ;;  %427 = vperm.xlu2 %855, %v357_v40  }
  0x4f   :  { %787 = vmatmul.msk.bf16.gmra.mxu0 %vm198_vm0, %v827_v41 }
  0x55   :  { %437 = vperm.xlu1 %854, %v359_v42  }
  0x56   :  { %432 = vperm.xlu0 %853, %v358_v43   ;;  %603 = vperm.xlu2 %855, %v585_v44  }
  0x5d   :  { %613 = vperm.xlu1 %854, %v587_v45  }
  0x5e   :  { %608 = vperm.xlu0 %853, %v586_v46   ;;  %618 = vperm.xlu2 %855, %v588_v47  }
  0x60   :  { %v119_v57 = vpop.permute.xlu2 %118 }
  0x65   :  { %628 = vperm.xlu1 %854, %v590_v48  }
  0x66   :  { %623 = vperm.xlu0 %853, %v589_v49   ;;  %633 = vperm.xlu2 %855, %v591_v50  }
  0x68   :  { %v124_v62 = vpop.permute.xlu2 %123 }
  0x6d   :  { %643 = vperm.xlu1 %854, %v593_v51  }
  0x6e   :  { %638 = vperm.xlu0 %853, %v592_v52   ;;  %648 = vperm.xlu2 %855, %v594_v53  }
  0x70   :  { %v1109_v1 = vpop.permute.xlu2 %98 }
  0x75   :  { %658 = vperm.xlu1 %854, %v596_v54  }
  0x76   :  { %653 = vperm.xlu0 %853, %v595_v55   ;;  %663 = vperm.xlu2 %855, %v597_v56  }
  0x77   :  { %v129_v24 = vpop.permute.xlu1 %128 }
  0x78   :  { %v139_v58 = vpop.permute.xlu0 %138  ;;  %v1115_v5 = vpop.permute.xlu2 %93 }
  0x7d   :  { %673 = vperm.xlu1 %854, %v599_v59  }
  0x7e   :  { %668 = vperm.xlu0 %853, %v598_v60   ;;  %678 = vperm.xlu2 %855, %v600_v61  }
  0x7f   :  { %v134_v28 = vpop.permute.xlu1 %133 }
  0x80   :  { %v144_v63 = vpop.permute.xlu0 %143  ;;  %v69_v10 = vpop.permute.xlu2 %68 }
  0x86   :  { %721 = vperm.xlu0 %853, %v718_v0  }
  0x87   :  { %v114_v51 = vpop.permute.xlu1 %113 }
  0x88   :  { %v1111_v2 = vpop.permute.xlu0 %108 }
  0x8c   :  { %v232_v3 = vpop.f32.mrf.mxu0 }
  0x8d   :  { %v233_v12 = vadd.f32 %v232_v3, %v69_v10 }
  0x8f   :  { %v288_v14 = vmul.f32 0.2, %v233_v12  ;;  %vm272_vm1 = vcmp.gt.f32.partialorder %v233_v12, 0.0  ;;  %v89_v54 = vpop.permute.xlu1 %88 }
  0x90   :  { %v1113_v4 = vpop.permute.xlu0 %103 }
  0x91   :  { %v304_v19 = vsel %vm272_vm1, %v233_v12, %v288_v14 }
  0x92   :  { %v257_v6 = vpop.f32.mrf.mxu3 }
  0x93   :  { %v258_v34 = vadd.f32 %v257_v6, %v119_v57 }
  0x94   :  { %v234_v7 = vpop.f32.mrf.mxu0 }
  0x95   :  { %v298_v43 = vmul.f32 0.2, %v258_v34  ;;  %vm282_vm7 = vcmp.gt.f32.partialorder %v258_v34, 0.0 }
  0x97   :  { %v314_v49 = vsel %vm282_vm7, %v258_v34, %v298_v43 }
  0x98   :  { %v1117_v8 = vpop.permute.xlu0 %78 }
  0x9a   :  { %v259_v9 = vpop.f32.mrf.mxu3 }
  0x9b   :  { %v260_v35 = vadd.f32 %v259_v9, %v124_v62  ;;  %v84_v9 = vpop.permute.xlu1 %83 }
  0x9c   :  { %v1119_v11 = vpop.f32.mrf.mxu0 }
  0x9d   :  { %v299_v44 = vmul.f32 0.2, %v260_v35  ;;  %vm283_vm8 = vcmp.gt.f32.partialorder %v260_v35, 0.0 }
  0x9f   :  { %v315_v50 = vsel %vm283_vm8, %v260_v35, %v299_v44 }
  0xa0   :  { %v74_v13 = vpop.permute.xlu0 %73  ;;  %v325_v52 = vpack.c.bf16 %v315_v50, %v314_v49 }
  0xa1   :  { %v235_v15 = vadd.f32 %v234_v7, %v74_v13 }
  0xa2   :  { %v262_v16 = vpop.f32.mrf.mxu3 }
  0xa3   :  { %v289_v17 = vmul.f32 0.2, %v235_v15  ;;  %vm273_vm2 = vcmp.gt.f32.partialorder %v235_v15, 0.0  ;;  %v263_v29 = vadd.f32 %v262_v16, %v129_v24  ;;  %v834_v24 = vld [vmem:[%s1194_s3 + $0x8] sm:$0xff] }
  0xa4   :  { %v1121_v18 = vpop.f32.mrf.mxu0 }
  0xa5   :  { %v305_v20 = vsel %vm273_vm2, %v235_v15, %v289_v17  ;;  %v300_v36 = vmul.f32 0.2, %v263_v29  ;;  %vm284_vm5 = vcmp.gt.f32.partialorder %v263_v29, 0.0 }
  0xa6   :  { %v1123_v21 = vpack.c.bf16 %v305_v20, %v304_v19 }
  0xa7   :  { %v316_v45 = vsel %vm284_vm5, %v263_v29, %v300_v36  ;;  %v363_v29 = vpop.permute.xlu1 %362 }
  0xaa   :  { %v264_v22 = vpop.f32.mrf.mxu3 }
  0xab   :  { %v265_v30 = vadd.f32 %v264_v22, %v134_v28  ;;  %v840_v28 = vld [vmem:[%s1194_s3 + $0x38] sm:$0xff] }
  0xac   :  { %v242_v23 = vpop.f32.mrf.mxu0 }
  0xad   :  { %v301_v38 = vmul.f32 0.2, %v265_v30  ;;  %vm285_vm6 = vcmp.gt.f32.partialorder %v265_v30, 0.0  ;;  %v243_v0 = vadd.f32 %v242_v23, %v89_v54 }
  0xaf   :  { %v317_v46 = vsel %vm285_vm6, %v265_v30, %v301_v38  ;;  %v292_v12 = vmul.f32 0.2, %v243_v0  ;;  %vm276_vm14 = vcmp.gt.f32.partialorder %v243_v0, 0.0  ;;  %v368_v30 = vpop.permute.xlu2 %367 }
  0xb0   :  { %v326_v48 = vpack.c.bf16 %v317_v46, %v316_v45 }
  0xb1   :  { %v308_v19 = vsel %vm276_vm14, %v243_v0, %v292_v12 }
  0xb2   :  { %v267_v25 = vpop.f32.mrf.mxu3 }
  0xb3   :  { %v268_v27 = vadd.f32 %v267_v25, %v139_v58  ;;  %v838_v25 = vld [vmem:[%s1194_s3 + $0x28] sm:$0xff] }
  0xb4   :  { %v244_v26 = vpop.f32.mrf.mxu0 }
  0xb5   :  { %v302_v31 = vmul.f32 0.2, %v268_v27  ;;  %vm286_vm3 = vcmp.gt.f32.partialorder %v268_v27, 0.0  ;;  %v245_v61 = vadd.f32 %v244_v26, %v1115_v5  ;;  %v238_v5 = vadd.f32 %v1119_v11, %v1117_v8  ;;  %v833_v8 = vld [vmem:[%s1194_s3] sm:$0xff]  ;;  %v835_v26 = vld [vmem:[%s1194_s3 + $0x10] sm:$0xff] }
  0xb6   :  { %v837_v11 = vld [vmem:[%s1194_s3 + $0x20] sm:$0xff] }
  0xb7   :  { %v318_v40 = vsel %vm286_vm3, %v268_v27, %v302_v31  ;;  %v293_v10 = vmul.f32 0.2, %v245_v61  ;;  %vm277_vm13 = vcmp.gt.f32.partialorder %v245_v61, 0.0  ;;  %v290_v17 = vmul.f32 0.2, %v238_v5  ;;  %v836_v27 = vld [vmem:[%s1194_s3 + $0x18] sm:$0xff]  ;;  %v373_v31 = vpop.permute.xlu0 %372 }
  0xb8   :  { %vm274_vm0 = vcmp.gt.f32.partialorder %v238_v5, 0.0 }
  0xb9   :  { %v309_v16 = vsel %vm277_vm13, %v245_v61, %v293_v10  ;;  %v306_v22 = vsel %vm274_vm0, %v238_v5, %v290_v17 }
  0xba   :  { %v269_v32 = vpop.f32.mrf.mxu3 }
  0xbb   :  { %v270_v33 = vadd.f32 %v269_v32, %v144_v63  ;;  %v378_v32 = vpop.permute.xlu1 %377 }
  0xbc   :  { %v247_v37 = vpop.f32.mrf.mxu0 }
  0xbd   :  { %v303_v39 = vmul.f32 0.2, %v270_v33  ;;  %vm287_vm4 = vcmp.gt.f32.partialorder %v270_v33, 0.0  ;;  %v248_v58 = vadd.f32 %v247_v37, %v1109_v1 }
  0xbf   :  { %v319_v41 = vsel %vm287_vm4, %v270_v33, %v303_v39  ;;  %v294_v3 = vmul.f32 0.2, %v248_v58  ;;  %vm278_vm12 = vcmp.gt.f32.partialorder %v248_v58, 0.0  ;;  %v383_v33 = vpop.permute.xlu2 %382  ;;  %v388_v34 = vpop.permute.xlu0 %387 }
  0xc0   :  { %v327_v42 = vpack.c.bf16 %v319_v41, %v318_v40 }
  0xc1   :  { %v310_v13 = vsel %vm278_vm12, %v248_v58, %v294_v3 }
  0xc2   :  { %488 = vmatpush.bf16.msra.mxu1 %v327_v42  ;;  %843 = vmatpush.bf16.msra.mxu2 %v327_v42 }
  0xc3   :  { %v393_v35 = vpop.permute.xlu1 %392 }
  0xc4   :  { %v249_v47 = vpop.f32.mrf.mxu0 }
  0xc5   :  { %v250_v56 = vadd.f32 %v249_v47, %v1113_v4  ;;  %v240_v4 = vadd.f32 %v1121_v18, %v84_v9  ;;  %v322_v18 = vpack.c.bf16 %v309_v16, %v308_v19 }
  0xc6   :  { %489 = vmatpush.bf16.msra.mxu1 %v326_v48  ;;  %844 = vmatpush.bf16.msra.mxu2 %v326_v48 }
  0xc7   :  { %v295_v62 = vmul.f32 0.2, %v250_v56  ;;  %vm279_vm11 = vcmp.gt.f32.partialorder %v250_v56, 0.0  ;;  %v291_v15 = vmul.f32 0.2, %v240_v4  ;;  %vm275_vm15 = vcmp.gt.f32.partialorder %v240_v4, 0.0  ;;  %v1158_v36 = vpop.permute.xlu2 %397  ;;  %v403_v38 = vpop.permute.xlu0 %402 }
  0xc9   :  { %v311_v1 = vsel %vm279_vm11, %v250_v56, %v295_v62  ;;  %v307_v20 = vsel %vm275_vm15, %v240_v4, %v291_v15 }
  0xca   :  { %490 = vmatpush.bf16.msra.mxu1 %v325_v52  ;;  %845 = vmatpush.bf16.msra.mxu2 %v325_v52  ;;  %v323_v14 = vpack.c.bf16 %v311_v1, %v310_v13  ;;  %v321_v23 = vpack.c.bf16 %v307_v20, %v306_v22 }
  0xcb   :  { %v1160_v39 = vpop.permute.xlu1 %407 }
  0xcc   :  { %v252_v53 = vpop.f32.mrf.mxu0 }
  0xcd   :  { %v253_v55 = vadd.f32 %v252_v53, %v1111_v2 }
  0xcf   :  { %v296_v59 = vmul.f32 0.2, %v253_v55  ;;  %vm280_vm9 = vcmp.gt.f32.partialorder %v253_v55, 0.0  ;;  %v1162_v41 = vpop.permute.xlu2 %412  ;;  %v1164_v43 = vpop.permute.xlu0 %417 }
  0xd1   :  { %v312_v6 = vsel %vm280_vm9, %v253_v55, %v296_v59 }
  0xd3   :  { %v1166_v45 = vpop.permute.xlu1 %422 }
  0xd4   :  { %v254_v57 = vpop.f32.mrf.mxu0 }
  0xd5   :  { %v255_v60 = vadd.f32 %v254_v57, %v114_v51 }
  0xd7   :  { %v297_v63 = vmul.f32 0.2, %v255_v60  ;;  %vm281_vm10 = vcmp.gt.f32.partialorder %v255_v60, 0.0  ;;  %v1168_v47 = vpop.permute.xlu2 %427  ;;  %v1170_v49 = vpop.permute.xlu0 %432 }
  0xd9   :  { %v313_v7 = vsel %vm281_vm10, %v255_v60, %v297_v63 }
  0xda   :  { %v324_v2 = vpack.c.bf16 %v313_v7, %v312_v6 }
  0xdb   :  { %v1172_v51 = vpop.permute.xlu1 %437 }
  0xdc   :  { %491 = vmatpush.bf16.msra.mxu1 %v324_v2  ;;  %846 = vmatpush.bf16.msra.mxu2 %v324_v2 }
  0xdf   :  { %v604_v52 = vpop.permute.xlu2 %603  ;;  %v609_v55 = vpop.permute.xlu0 %608 }
  0xe0   :  { %492 = vmatpush.bf16.msra.mxu1 %v323_v14  ;;  %847 = vmatpush.bf16.msra.mxu2 %v323_v14 }
  0xe3   :  { %v614_v56 = vpop.permute.xlu1 %613 }
  0xe4   :  { %493 = vmatpush.bf16.msra.mxu1 %v322_v18  ;;  %848 = vmatpush.bf16.msra.mxu2 %v322_v18 }
  0xe7   :  { %v619_v57 = vpop.permute.xlu2 %618  ;;  %v624_v3 = vpop.permute.xlu0 %623 }
  0xe8   :  { %494 = vmatpush.bf16.msra.mxu1 %v321_v23  ;;  %849 = vmatpush.bf16.msra.mxu2 %v321_v23 }
  0xeb   :  { %v629_v2 = vpop.permute.xlu1 %628 }
  0xec   :  { %495 = vmatpush.bf16.msra.mxu1 %v1123_v21  ;;  %850 = vmatpush.bf16.msra.mxu2 %v1123_v21  ;;  %v839_v21 = vld [vmem:[%s1194_s3 + $0x30] sm:$0xff]  ;;  %s883_s3 = smov [#allocation3]  }
  0xed   :  { %s732_s25 = sshll.u32 %s883_s3, 4  ;;  %s733_s25 = int_to_ptr.vmem [resolvable:$true] %s732_s25 }
  0xef   :  { %496 = vmatmul.bf16.vlgmr.msra.gmra.mxu1 %v833_v8  ;;  %516 = vmatmul.bf16.vlgmr.msra.gmra.mxu2 %v837_v11  ;;  %v634_v12 = vpop.permute.xlu2 %633 }
  0xff   :  { %501 = vmatmul.bf16.gmra.mxu1 %v834_v24  ;;  %521 = vmatmul.bf16.gmra.mxu2 %v838_v25 }
 0x10f   :  { %506 = vmatmul.bf16.gmra.mxu1 %v835_v26  ;;  %526 = vmatmul.bf16.gmra.mxu2 %v839_v21  ;;  %v639_v26 = vpop.permute.xlu0 %638 }
 0x11f   :  { %511 = vmatmul.bf16.gmra.mxu1 %v836_v27  ;;  %531 = vmatmul.bf16.gmra.mxu2 %v840_v28 }
 0x16c   :  { %v497_v37 = vpop.f32.mrf.mxu1 }
 0x16d   :  { %v498_v60 = vadd.f32 %v497_v37, %v363_v29 }
 0x16f   :  { %v553_v6 = vmul.f32 0.2, %v498_v60  ;;  %vm537_vm2 = vcmp.gt.f32.partialorder %v498_v60, 0.0 }
 0x171   :  { %v569_v13 = vsel %vm537_vm2, %v498_v60, %v553_v6 }
 0x172   :  { %v517_v40 = vpop.f32.mrf.mxu2  ;;  %v681_v22 = vmul.f32 %v604_v52, %v569_v13 }
 0x173   :  { %v518_v21 = vadd.f32 %v517_v40, %v403_v38 }
 0x174   :  { %v499_v42 = vpop.f32.mrf.mxu1 }
 0x175   :  { %v500_v58 = vadd.f32 %v499_v42, %v368_v30  ;;  %v649_v42 = vpop.permute.xlu2 %648  ;;  %vm545_vm8 = vcmp.gt.f32.partialorder %v518_v21, 0.0 }
 0x177   :  { %v554_v63 = vmul.f32 0.2, %v500_v58  ;;  %vm538_vm1 = vcmp.gt.f32.partialorder %v500_v58, 0.0 }
 0x179   :  { %v570_v4 = vsel %vm538_vm1, %v500_v58, %v554_v63 }
 0x17a   :  { %v519_v44 = vpop.f32.mrf.mxu2  ;;  %v682_v16 = vmul.f32 %v609_v55, %v570_v4 }
 0x17c   :  { %v502_v46 = vpop.f32.mrf.mxu1  ;;  %v697_v24 = vadd.f32 %v682_v16, %v681_v22 }
 0x17d   :  { %v503_v61 = vadd.f32 %v502_v46, %v373_v31  ;;  %v644_v31 = vpop.permute.xlu1 %643  ;;  %v561_v46 = vmul.f32 0.2, %v518_v21 }
 0x17f   :  { %v555_v7 = vmul.f32 0.2, %v503_v61  ;;  %vm539_vm3 = vcmp.gt.f32.partialorder %v503_v61, 0.0 }
 0x181   :  { %v571_v14 = vsel %vm539_vm3, %v503_v61, %v555_v7 }
 0x182   :  { %v522_v48 = vpop.f32.mrf.mxu2  ;;  %v683_v23 = vmul.f32 %v614_v56, %v571_v14 }
 0x184   :  { %v504_v50 = vpop.f32.mrf.mxu1  ;;  %v698_v28 = vadd.f32 %v697_v24, %v683_v23 }
 0x185   :  { %v505_v0 = vadd.f32 %v504_v50, %v378_v32  ;;  %v520_v32 = vadd.f32 %v519_v44, %v1160_v39  ;;  %v523_v50 = vadd.f32 %v522_v48, %v1162_v41  ;;  %v577_v44 = vsel %vm545_vm8, %v518_v21, %v561_v46  ;;  %v654_v48 = vpop.permute.xlu0 %653 }
 0x187   :  { %v556_v10 = vmul.f32 0.2, %v505_v0  ;;  %vm540_vm4 = vcmp.gt.f32.partialorder %v505_v0, 0.0  ;;  %v562_v40 = vmul.f32 0.2, %v520_v32  ;;  %vm546_vm10 = vcmp.gt.f32.partialorder %v520_v32, 0.0 }
 0x188   :  { %vm547_vm11 = vcmp.gt.f32.partialorder %v523_v50, 0.0 }
 0x189   :  { %v572_v19 = vsel %vm540_vm4, %v505_v0, %v556_v10  ;;  %v578_v61 = vsel %vm546_vm10, %v520_v32, %v562_v40  ;;  %v689_v0 = vmul.f32 %v644_v31, %v577_v44 }
 0x18a   :  { %v1174_v53 = vpop.f32.mrf.mxu2  ;;  %v684_v25 = vmul.f32 %v619_v57, %v572_v19  ;;  %v563_v57 = vmul.f32 0.2, %v523_v50 }
 0x18b   :  { %v525_v55 = vadd.f32 %v1174_v53, %v1164_v43 }
 0x18c   :  { %v507_v54 = vpop.f32.mrf.mxu1  ;;  %v579_v6 = vsel %vm547_vm11, %v523_v50, %v563_v57 }
 0x18d   :  { %v508_v9 = vadd.f32 %v507_v54, %v383_v33  ;;  %vm548_vm12 = vcmp.gt.f32.partialorder %v525_v55, 0.0 }
 0x18f   :  { %v557_v15 = vmul.f32 0.2, %v508_v9  ;;  %vm541_vm5 = vcmp.gt.f32.partialorder %v508_v9, 0.0 }
 0x191   :  { %v573_v8 = vsel %vm541_vm5, %v508_v9, %v557_v15 }
 0x192   :  { %v1176_v59 = vpop.f32.mrf.mxu2  ;;  %v685_v29 = vmul.f32 %v624_v3, %v573_v8  ;;  %v659_v3 = vpop.permute.xlu1 %658 }
 0x193   :  { %v528_v58 = vadd.f32 %v1176_v59, %v1166_v45  ;;  %v664_v59 = vpop.permute.xlu2 %663 }
 0x194   :  { %v509_v62 = vpop.f32.mrf.mxu1 }
 0x195   :  { %v510_v1 = vadd.f32 %v509_v62, %v388_v34  ;;  %v699_v34 = vadd.f32 %v698_v28, %v684_v25  ;;  %v564_v62 = vmul.f32 0.2, %v525_v55  ;;  %v565_v7 = vmul.f32 0.2, %v528_v58 }
 0x196   :  { %vm549_vm13 = vcmp.gt.f32.partialorder %v528_v58, 0.0 }
 0x197   :  { %v558_v18 = vmul.f32 0.2, %v510_v1  ;;  %vm542_vm6 = vcmp.gt.f32.partialorder %v510_v1, 0.0  ;;  %v700_v54 = vadd.f32 %v699_v34, %v685_v29  ;;  %v580_v4 = vsel %vm548_vm12, %v525_v55, %v564_v62 }
 0x198   :  { %v692_v14 = vmul.f32 %v659_v3, %v580_v4 }
 0x199   :  { %v574_v27 = vsel %vm542_vm6, %v510_v1, %v558_v18  ;;  %v669_v18 = vpop.permute.xlu0 %668 }
 0x19a   :  { %v529_v5 = vpop.f32.mrf.mxu2  ;;  %v674_v8 = vpop.permute.xlu1 %673 }
 0x19b   :  { %v530_v63 = vadd.f32 %v529_v5, %v1168_v47  ;;  %v581_v5 = vsel %vm549_vm13, %v528_v58, %v565_v7  ;;  %v679_v25 = vpop.permute.xlu2 %678 }
 0x19c   :  { %v512_v17 = vpop.f32.mrf.mxu1  ;;  %v693_v19 = vmul.f32 %v664_v59, %v581_v5 }
 0x19d   :  { %v513_v20 = vadd.f32 %v512_v17, %v393_v35  ;;  %v686_v35 = vmul.f32 %v629_v2, %v574_v27  ;;  %v690_v2 = vmul.f32 %v649_v42, %v578_v61  ;;  %v566_v10 = vmul.f32 0.2, %v530_v63 }
 0x19e   :  { %vm550_vm14 = vcmp.gt.f32.partialorder %v530_v63, 0.0 }
 0x19f   :  { %v559_v11 = vmul.f32 0.2, %v513_v20  ;;  %vm543_vm7 = vcmp.gt.f32.partialorder %v513_v20, 0.0  ;;  %v701_v39 = vadd.f32 %v700_v54, %v686_v35  ;;  %v582_v16 = vsel %vm550_vm14, %v530_v63, %v566_v10 }
 0x1a0   :  { %v694_v22 = vmul.f32 %v669_v18, %v582_v16 }
 0x1a1   :  { %v575_v33 = vsel %vm543_vm7, %v513_v20, %v559_v11  ;;  %v722_v32 = vpop.permute.xlu0 %721 }
 0x1a2   :  { %v532_v30 = vpop.f32.mrf.mxu2  ;;  %v687_v38 = vmul.f32 %v634_v12, %v575_v33  ;;  %v691_v12 = vmul.f32 %v654_v48, %v579_v6  ;;  %v724_v34 = vperm.slane %v722_v32, 0 }
 0x1a3   :  { %v533_v9 = vadd.f32 %v532_v30, %v1170_v49 }
 0x1a4   :  { %v514_v37 = vpop.f32.mrf.mxu1  ;;  %v702_v41 = vadd.f32 %v701_v39, %v687_v38 }
 0x1a5   :  { %v515_v52 = vadd.f32 %v514_v37, %v1158_v36  ;;  %v567_v13 = vmul.f32 0.2, %v533_v9  ;;  %vm551_vm15 = vcmp.gt.f32.partialorder %v533_v9, 0.0 }
 0x1a7   :  { %vm544_vm9 = vcmp.gt.f32.partialorder %v515_v52, 0.0  ;;  %v560_v56 = vmul.f32 0.2, %v515_v52  ;;  %v583_v20 = vsel %vm551_vm15, %v533_v9, %v567_v13 }
 0x1a9   :  { %v576_v60 = vsel %vm544_vm9, %v515_v52, %v560_v56 }
 0x1aa   :  { %v688_v36 = vmul.f32 %v639_v26, %v576_v60  ;;  %v534_v53 = vpop.f32.mrf.mxu2 }
 0x1ab   :  { %v535_v1 = vadd.f32 %v534_v53, %v1172_v51  ;;  %v695_v51 = vmul.f32 %v674_v8, %v583_v20 }
 0x1ac   :  { %v703_v43 = vadd.f32 %v702_v41, %v688_v36 }
 0x1ad   :  { %v568_v17 = vmul.f32 0.2, %v535_v1  ;;  %vm552_vm0 = vcmp.gt.f32.partialorder %v535_v1, 0.0 }
 0x1ae   :  { %v704_v45 = vadd.f32 %v703_v43, %v689_v0 }
 0x1af   :  { %v584_v11 = vsel %vm552_vm0, %v535_v1, %v568_v17 }
 0x1b0   :  { %v705_v47 = vadd.f32 %v704_v45, %v690_v2  ;;  %v696_v26 = vmul.f32 %v679_v25, %v584_v11 }
 0x1b2   :  { %v706_v15 = vadd.f32 %v705_v47, %v691_v12 }
 0x1b4   :  { %v707_v49 = vadd.f32 %v706_v15, %v692_v14 }
 0x1b6   :  { %v708_v23 = vadd.f32 %v707_v49, %v693_v19 }
 0x1b8   :  { %v709_v24 = vadd.f32 %v708_v23, %v694_v22 }
 0x1ba   :  { %v710_v21 = vadd.f32 %v709_v24, %v695_v51 }
 0x1bc   :  { %v711_v27 = vadd.f32 %v710_v21, %v696_v26 }
 0x1be   :  { %v712_v28 = vrot.slane %v711_v27, 4 }
 0x1c0   :  { %v713_v29 = vadd.f32 %v712_v28, %v711_v27 }
 0x1c2   :  { %v714_v30 = vrot.slane %v713_v29, 2 }
 0x1c4   :  { %v715_v31 = vadd.f32 %v714_v30, %v713_v29 }
 0x1c6   :  { %v716_v33 = vrot.slane %v715_v31, 1 }
 0x1c8   :  { %v717_v35 = vadd.f32 %v716_v33, %v715_v31 }
 0x1ca   :  { %v725_v37 = vadd.f32 %v724_v34, %v717_v35 }
 0x1cc   :  { %726 = vst [vmem:[#allocation3] sm:$0x1] %v725_v37 }
 0x1cd   :  { %737 = dma.vmem_to_hbm [thread:$0]  %s733_s25, 16, %s735_s2, [#allocation4]  }
 0x1ce   :  { %880 = dma.done.wait [#allocation4], 16  }
 0x1cf   :  { %881 = vsyncadd [#allocation4], 4294967280 }
 0x1d0   :  { %742 = vsyncpa [#allocation4], 1 }

</bundles_post_ra>
